<compile_context>
chip_gen: v7x
topology: tpu7x:2x2x1
jax: 0.10.0
libtpu: 0.0.40
codegen_flags: <defaults>
</compile_context>

<pallas_src>
import functools

import jax
import jax.numpy as jnp
from jax import lax
from jax.experimental import pallas as pl
from jax.experimental.pallas import tpu as pltpu


def _swish_f32(z):
    # Swish / SiLU via tanh: z * sigmoid(z) = 0.5 * z * (tanh(0.5*z) + 1).
    # Single EUP op per element; the extra mul/add rides on idle VALU slots.
    return 0.5 * z * (jnp.tanh(0.5 * z) + 1.0)


def mlp_kernel(x_ref, w12_ref, w3_ref, bias_ref, o_ref, *, D, P, num_steps):
    # x_ref:    (M, D)      f32   (M padded to a multiple of 8 rows)
    # w12_ref:  (D + P, P)  bf16  rows [0:D] = w1, rows [D:D+P] = w2
    # w3_ref:   (P, D)      bf16
    # bias_ref: (1, 2P + D) f32   [0:P]=b1, [P:2P]=b2, [2P:2P+D]=b3
    x = x_ref[...].astype(jnp.float32)

    def step(x):
        xb = x.astype(jnp.bfloat16)
        # Weights are read at the point of use (no loop-invariant hoisting):
        # keeps the ~40 vregs of bf16 weights out of the carried live set.
        h1 = jnp.dot(xb, w12_ref[pl.ds(0, D), :],
                     preferred_element_type=jnp.float32)
        h1 = _swish_f32(h1 + bias_ref[:, pl.ds(0, P)])
        h2 = jnp.dot(h1.astype(jnp.bfloat16), w12_ref[pl.ds(D, P), :],
                     preferred_element_type=jnp.float32)
        h2 = _swish_f32(h2 + bias_ref[:, pl.ds(P, P)])
        dx = jnp.dot(h2.astype(jnp.bfloat16), w3_ref[...],
                     preferred_element_type=jnp.float32)
        dx = dx + bias_ref[:, pl.ds(2 * P, D)]
        return x + dx

    if num_steps == 1:
        x = step(x)
    else:
        # Static trip count -> full unroll: lets the scheduler interleave the
        # MXU pushes of step i+1 with the swish/residual epilogue of step i.
        x = lax.fori_loop(0, num_steps, lambda _, s: step(s), x, unroll=True)

    o_ref[...] = x.astype(o_ref.dtype)


def init_params(key, latent_dim, latent_resolution, propagator_dim):
    """Deterministic PyTorch-Linear-style init (uniform(-1/sqrt(fan_in), ...)).

    Returned in the module's native layout: w (in, out) with the input/output
    D axis in '(h w c)' order, biases (1, out), all f32."""
    D = latent_dim * latent_resolution ** 2
    P = propagator_dim
    ks = jax.random.split(key, 6)

    def lin(kw, kb, fan_in, fan_out):
        bound = 1.0 / jnp.sqrt(fan_in)
        w = jax.random.uniform(kw, (fan_in, fan_out), jnp.float32, -bound, bound)
        b = jax.random.uniform(kb, (1, fan_out), jnp.float32, -bound, bound)
        return w, b

    w1, b1 = lin(ks[0], ks[1], D, P)
    w2, b2 = lin(ks[2], ks[3], P, P)
    w3, b3 = lin(ks[4], ks[5], P, D)
    return (w1, b1, w2, b2, w3, b3)


def prepare_params(params, latent_dim, latent_resolution):
    """One-time offline transform of the PyTorch parameters for the kernel.

    1) Fold the 'b c h w -> (h w c)' rearrange (and its inverse) into the
       weight ordering: permute rows of w1 and columns of w3/b3 from
       (h w c)-order to the natural NCHW-flatten (c h w)-order, so the kernel
       consumes x.reshape(b, D) directly with no transposes in the hot path.
    2) Pack: stack w1/w2 into one (D+P, P) bf16 slab, concat b1/b2/b3 into a
       single (1, 2P+D) f32 row -> 4 kernel inputs instead of 7.
    3) Weights cast to bf16 (MXU-native, half the HBM weight traffic);
       biases stay f32."""
    C = latent_dim
    H = W = latent_resolution
    D = C * H * W
    w1, b1, w2, b2, w3, b3 = params
    P = w1.shape[1]

    # hwc row order -> chw row order:  w1p[c*H*W + h*W + w] = w1[h*W*C + w*C + c]
    w1p = w1.reshape(H, W, C, P).transpose(2, 0, 1, 3).reshape(D, P)
    # hwc column order -> chw column order for the output projection.
    w3p = w3.reshape(P, H, W, C).transpose(0, 3, 1, 2).reshape(P, D)
    b3p = b3.reshape(1, H, W, C).transpose(0, 3, 1, 2).reshape(1, D)

    w12 = jnp.concatenate([w1p, w2], axis=0).astype(jnp.bfloat16)      # (D+P, P)
    w3b = w3p.astype(jnp.bfloat16)                                     # (P, D)
    biases = jnp.concatenate([b1, b2, b3p], axis=1).astype(jnp.float32)  # (1, 2P+D)
    return (w12, w3b, biases)


@functools.partial(jax.jit, static_argnames=("num_steps",))
def simple_mlp_forward(x, prepared_params, num_steps=1):
    """Applies out = x + MLP(x) `num_steps` times (num_steps=1 == module fwd)."""
    b, c, h, w = x.shape
    D = c * h * w
    w12, w3, biases = prepared_params
    P = w12.shape[1]

    # Rearranges are folded into the weights -> a pure reshape, no transpose.
    x_flat = x.reshape(b, D)

    # Pad the batch to a multiple of 8 rows: full f32 sublanes for the
    # activations / residual carry / output stores (and a fresh buffer that
    # is safe to donate to the aliased output).
    M_pad = max(8, -(-b // 8) * 8)
    if M_pad != b:
        x_flat = jnp.concatenate(
            [x_flat, jnp.zeros((M_pad - b, D), x_flat.dtype)], axis=0)

    def whole(a):
        n = a.ndim
        return pl.BlockSpec(a.shape, lambda i, n=n: (0,) * n)

    out_flat = pl.pallas_call(
        functools.partial(mlp_kernel, D=D, P=P, num_steps=num_steps),
        out_shape=jax.ShapeDtypeStruct((M_pad, D), x.dtype),
        grid=(1,),
        in_specs=[
            whole(x_flat),
            whole(w12),
            whole(w3),
            whole(biases),
        ],
        out_specs=pl.BlockSpec((M_pad, D), lambda i: (0, 0)),
        input_output_aliases={0: 0},   # x_flat buffer reused as the output
        compiler_params=pltpu.CompilerParams(
            dimension_semantics=("arbitrary",)),
    )(x_flat, w12, w3, biases)

    return out_flat[:b].reshape(b, c, h, w)


def reference_forward(x, params):
    """Pure-JAX f32 reference mirroring the PyTorch module exactly
    (original un-permuted f32 params, explicit '(h w c)' rearranges)."""
    b, c, h, w = x.shape
    w1, b1, w2, b2, w3, b3 = params
    xf = jnp.transpose(x, (0, 2, 3, 1)).reshape(b, -1)
    h1 = xf @ w1 + b1
    h1 = h1 * jax.nn.sigmoid(h1)
    h2 = h1 @ w2 + b2
    h2 = h2 * jax.nn.sigmoid(h2)
    dx = h2 @ w3 + b3
    out = xf + dx
    return jnp.transpose(out.reshape(b, h, w, c), (0, 3, 1, 2))


if __name__ == "__main__":
    # args: latent_dim=4, latent_resolution=8, propagator_dim=128
    latent_dim = 4
    latent_resolution = 8
    propagator_dim = 128
    batch = 2

    key = jax.random.PRNGKey(0)
    kx, kp = jax.random.split(key)

    x = jax.random.normal(
        kx, (batch, latent_dim, latent_resolution, latent_resolution),
        jnp.float32)
    params = init_params(kp, latent_dim, latent_resolution, propagator_dim)
    kernel_params = prepare_params(params, latent_dim, latent_resolution)

    # Single forward step (== PyTorch module forward).
    out = simple_mlp_forward(x, kernel_params)
    out = jax.block_until_ready(out)
    ref = reference_forward(x, params)
    assert out.shape == x.shape
    # bf16 matmul inputs (f32 accumulate) give ~1e-3 absolute deviation vs
    # the full-f32 reference here.
    assert jnp.allclose(out, ref, atol=2e-2, rtol=2e-2), "mismatch vs reference"

    # Weight-resident rollout: 3 propagator steps inside ONE pallas_call
    # (weights DMA'd from HBM once, reused every step; loop fully unrolled).
    steps = 3
    out_roll = jax.block_until_ready(
        simple_mlp_forward(x, kernel_params, num_steps=steps))
    ref_roll = x
    for _ in range(steps):
        ref_roll = reference_forward(ref_roll, params)
    # Per-step drift is bounded by the bf16 rounding of x/h1/h2 (~2^-8
    # relative) times the Lipschitz constant of x + MLP(x); tolerance grows
    # mildly with step count.
    assert jnp.allclose(out_roll, ref_roll, atol=3e-2, rtol=3e-2), \
        "mismatch vs rollout reference"

    print("KERNEL_OK")
</pallas_src>

<mosaic_0001>
module attributes {stable_mosaic.version = 11 : i64} {
  func.func @mlp_kernel(%arg0: i32, %arg1: memref<8x256xf32, #tpu.memory_space<vmem>>, %arg2: memref<384x128xbf16, #tpu.memory_space<vmem>>, %arg3: memref<128x256xbf16, #tpu.memory_space<vmem>>, %arg4: memref<1x512xf32, #tpu.memory_space<vmem>>, %arg5: memref<8x256xf32, #tpu.memory_space<vmem>>) attributes {dimension_semantics = [#tpu.dimension_semantics<arbitrary>], iteration_bounds = array<i64: 1>, scalar_prefetch = 0 : i64, scratch_operands = 0 : i64, tpu.core_type = #tpu.core_type<tc>, window_params = [{pipeline_mode = #tpu.pipeline_mode<synchronous>, transform_indices = @transform_0, window_bounds = array<i64: 8, 256>}, {pipeline_mode = #tpu.pipeline_mode<synchronous>, transform_indices = @transform_1, window_bounds = array<i64: 384, 128>}, {pipeline_mode = #tpu.pipeline_mode<synchronous>, transform_indices = @transform_2, window_bounds = array<i64: 128, 256>}, {pipeline_mode = #tpu.pipeline_mode<synchronous>, transform_indices = @transform_3, window_bounds = array<i64: 1, 512>}, {pipeline_mode = #tpu.pipeline_mode<synchronous>, transform_indices = @transform_4, window_bounds = array<i64: 8, 256>}]} {
    %c0 = arith.constant 0 : index
    %c0_0 = arith.constant 0 : index
    %0 = vector.load %arg1[%c0, %c0_0] : memref<8x256xf32, #tpu.memory_space<vmem>>, vector<8x256xf32>
    %1 = arith.truncf %0 : vector<8x256xf32> to vector<8x256xbf16>
    %c0_1 = arith.constant 0 : index
    %c0_2 = arith.constant 0 : index
    %2 = vector.load %arg2[%c0_1, %c0_2] : memref<384x128xbf16, #tpu.memory_space<vmem>>, vector<256x128xbf16>
    %cst = arith.constant dense<0.000000e+00> : vector<8x128xf32>
    %3 = tpu.matmul %1, %2, %cst {dimension_numbers = #tpu.dot_dimension_numbers<[1], [0], [0], [1], [0, 0, 1, 1], [], []>} : vector<8x256xbf16>, vector<256x128xbf16>, vector<8x128xf32> -> vector<8x128xf32>
    %c0_3 = arith.constant 0 : index
    %c0_4 = arith.constant 0 : index
    %4 = vector.load %arg4[%c0_3, %c0_4] : memref<1x512xf32, #tpu.memory_space<vmem>>, vector<1x128xf32>
    %5 = vector.broadcast %4 : vector<1x128xf32> to vector<8x128xf32>
    %6 = arith.addf %3, %5 : vector<8x128xf32>
    %cst_5 = arith.constant 5.000000e-01 : f32
    %7 = vector.broadcast %cst_5 : f32 to vector<8x128xf32>
    %8 = arith.mulf %7, %6 : vector<8x128xf32>
    %cst_6 = arith.constant 5.000000e-01 : f32
    %9 = vector.broadcast %cst_6 : f32 to vector<8x128xf32>
    %10 = arith.mulf %9, %6 : vector<8x128xf32>
    %11 = math.tanh %10 : vector<8x128xf32>
    %cst_7 = arith.constant 1.000000e+00 : f32
    %12 = vector.broadcast %cst_7 : f32 to vector<8x128xf32>
    %13 = arith.addf %11, %12 : vector<8x128xf32>
    %14 = arith.mulf %8, %13 : vector<8x128xf32>
    %15 = arith.truncf %14 : vector<8x128xf32> to vector<8x128xbf16>
    %c256 = arith.constant 256 : index
    %c0_8 = arith.constant 0 : index
    %16 = vector.load %arg2[%c256, %c0_8] : memref<384x128xbf16, #tpu.memory_space<vmem>>, vector<128x128xbf16>
    %cst_9 = arith.constant dense<0.000000e+00> : vector<8x128xf32>
    %17 = tpu.matmul %15, %16, %cst_9 {dimension_numbers = #tpu.dot_dimension_numbers<[1], [0], [0], [1], [0, 0, 1, 1], [], []>} : vector<8x128xbf16>, vector<128x128xbf16>, vector<8x128xf32> -> vector<8x128xf32>
    %c0_10 = arith.constant 0 : index
    %c128 = arith.constant 128 : index
    %18 = vector.load %arg4[%c0_10, %c128] : memref<1x512xf32, #tpu.memory_space<vmem>>, vector<1x128xf32>
    %19 = vector.broadcast %18 : vector<1x128xf32> to vector<8x128xf32>
    %20 = arith.addf %17, %19 : vector<8x128xf32>
    %cst_11 = arith.constant 5.000000e-01 : f32
    %21 = vector.broadcast %cst_11 : f32 to vector<8x128xf32>
    %22 = arith.mulf %21, %20 : vector<8x128xf32>
    %cst_12 = arith.constant 5.000000e-01 : f32
    %23 = vector.broadcast %cst_12 : f32 to vector<8x128xf32>
    %24 = arith.mulf %23, %20 : vector<8x128xf32>
    %25 = math.tanh %24 : vector<8x128xf32>
    %cst_13 = arith.constant 1.000000e+00 : f32
    %26 = vector.broadcast %cst_13 : f32 to vector<8x128xf32>
    %27 = arith.addf %25, %26 : vector<8x128xf32>
    %28 = arith.mulf %22, %27 : vector<8x128xf32>
    %29 = arith.truncf %28 : vector<8x128xf32> to vector<8x128xbf16>
    %c0_14 = arith.constant 0 : index
    %c0_15 = arith.constant 0 : index
    %30 = vector.load %arg3[%c0_14, %c0_15] : memref<128x256xbf16, #tpu.memory_space<vmem>>, vector<128x256xbf16>
    %cst_16 = arith.constant dense<0.000000e+00> : vector<8x256xf32>
    %31 = tpu.matmul %29, %30, %cst_16 {dimension_numbers = #tpu.dot_dimension_numbers<[1], [0], [0], [1], [0, 0, 1, 1], [], []>} : vector<8x128xbf16>, vector<128x256xbf16>, vector<8x256xf32> -> vector<8x256xf32>
    %c0_17 = arith.constant 0 : index
    %c256_18 = arith.constant 256 : index
    %32 = vector.load %arg4[%c0_17, %c256_18] : memref<1x512xf32, #tpu.memory_space<vmem>>, vector<1x256xf32>
    %33 = vector.broadcast %32 : vector<1x256xf32> to vector<8x256xf32>
    %34 = arith.addf %31, %33 : vector<8x256xf32>
    %35 = arith.addf %0, %34 : vector<8x256xf32>
    %c0_19 = arith.constant 0 : index
    %c0_20 = arith.constant 0 : index
    %36 = vector.load %arg5[%c0_19, %c0_20] : memref<8x256xf32, #tpu.memory_space<vmem>>, vector<8x256xf32>
    tpu.vector_store %arg5[%c0_19, %c0_20], %35 {strides = array<i32>} : memref<8x256xf32, #tpu.memory_space<vmem>>, vector<8x256xf32>,
    return
  }
  func.func @transform_0(%arg0: i32) -> (i32, i32) {
    %c0_i32 = arith.constant 0 : i32
    %c0_i32_0 = arith.constant 0 : i32
    %c0_i32_1 = arith.constant 0 : i32
    return %c0_i32, %c0_i32_0 : i32, i32
  }
  func.func @transform_1(%arg0: i32) -> (i32, i32) {
    %c0_i32 = arith.constant 0 : i32
    %c0_i32_0 = arith.constant 0 : i32
    %c0_i32_1 = arith.constant 0 : i32
    return %c0_i32, %c0_i32_0 : i32, i32
  }
  func.func @transform_2(%arg0: i32) -> (i32, i32) {
    %c0_i32 = arith.constant 0 : i32
    %c0_i32_0 = arith.constant 0 : i32
    %c0_i32_1 = arith.constant 0 : i32
    return %c0_i32, %c0_i32_0 : i32, i32
  }
  func.func @transform_3(%arg0: i32) -> (i32, i32) {
    %c0_i32 = arith.constant 0 : i32
    %c0_i32_0 = arith.constant 0 : i32
    %c0_i32_1 = arith.constant 0 : i32
    return %c0_i32, %c0_i32_0 : i32, i32
  }
  func.func @transform_4(%arg0: i32) -> (i32, i32) {
    %c0_i32 = arith.constant 0 : i32
    %c0_i32_0 = arith.constant 0 : i32
    %c0_i32_1 = arith.constant 0 : i32
    return %c0_i32, %c0_i32_0 : i32, i32
  }
}

</mosaic_0001>

<bundles_post_ra>
// kernel: simple_mlp_forward.1
= control target key start
LH: loop header
LB: loop body
LE: loop exit
PB: predicated region body
PF: predicated region fallthrough
CT: control target
= control target key end

     0   :  { %9 = vsyncpa [#allocation3], 0  ;;  %s796_s0 = inlined_call_operand.vmem [shape: f32[8,256], index: 0, kind: input, shape index: {}, may-alias: {0,4}]   ;;  %s797_s1 = inlined_call_operand.hbm [shape: bf16[384,128], index: 1, kind: input, shape index: {}]   ;;  %s798_s2 = inlined_call_operand.hbm [shape: bf16[128,256], index: 2, kind: input, shape index: {}]   ;;  %s799_s3 = inlined_call_operand.vmem [shape: f32[1,512], index: 3, kind: input, shape index: {}]   ;;  %s800_s4 = inlined_call_operand.vmem [shape: f32[8,256], index: 4, kind: output, shape index: {}, may-alias: {0,4}]  }
   0x1   :  { %10 = vsyncpa [#allocation5], 0  ;;  %s707_s15 = smov [#allocation2]   ;;  %s659_s19 = scalar_lea.hbm %s797_s1, 3072 }
   0x2   :  { %s18_s16 = sshll.u32 %s707_s15, 4  ;;  %p660_p0 = scmp.ne.s32.totalorder %s797_s1, %s659_s19  ;;  %s19_s16 = int_to_ptr.vmem [resolvable:$true] %s18_s16 }
   0x3   :  { %p663_p1 = scmp.lt.u32.totalorder %s659_s19, %s797_s1 }
   0x5   :  { %p665_p2 = pnand %p663_p1, %p660_p0 }
   0x7   :  { %668 = shalt.err (!%p665_p2)
}
   0x8   :  { %s669_s24 = scalar_lea.vmem %s19_s16, 3072  ;;  %p674_p4 = scmp.lt.s32.totalorder %s19_s16, %s19_s16 }
   0x9   :  { %p670_p3 = scmp.ne.s32.totalorder %s19_s16, %s669_s24  ;;  %p675_p5 = scmp.lt.s32.totalorder %s669_s24, %s669_s24 }
   0xb   :  { %p676_p6 = por %p675_p5, %p674_p4 }
   0xd   :  { %p677_p7 = pnand %p676_p6, %p670_p3 }
   0xf   :  { %680 = shalt.err (!%p677_p7)
}
  0x10   :  { %s708_s25 = smov 64   ;;  %s709_s26 = smov 4  }
  0x11   :  { %24 = dma.hbm_to_vmem [thread:$0]  %s797_s1, 3072, %s19_s16, [#allocation3], %s708_s25, %s708_s25, %s709_s26  }
  0x12   :  { %s710_s29 = smov [#allocation4]   ;;  %s681_s7 = scalar_lea.hbm %s798_s2, 2048 }
  0x13   :  { %s30_s30 = sshll.u32 %s710_s29, 4  ;;  %p682_p8 = scmp.ne.s32.totalorder %s798_s2, %s681_s7  ;;  %s31_s30 = int_to_ptr.vmem [resolvable:$true] %s30_s30 }
  0x14   :  { %p685_p9 = scmp.lt.u32.totalorder %s681_s7, %s798_s2 }
  0x16   :  { %p687_p10 = pnand %p685_p9, %p682_p8 }
  0x18   :  { %690 = shalt.err (!%p687_p10)
}
  0x19   :  { %s691_s12 = scalar_lea.vmem %s31_s30, 2048  ;;  %p696_p12 = scmp.lt.s32.totalorder %s31_s30, %s31_s30 }
  0x1a   :  { %p692_p11 = scmp.ne.s32.totalorder %s31_s30, %s691_s12  ;;  %p697_p13 = scmp.lt.s32.totalorder %s691_s12, %s691_s12 }
  0x1c   :  { %p698_p0 = por %p697_p13, %p696_p12 }
  0x1e   :  { %p699_p1 = pnand %p698_p0, %p692_p11 }
  0x20   :  { %702 = shalt.err (!%p699_p1)
}
  0x21   :  { %s711_s1 = smov 128   ;;  %s712_s13 = smov 8  }
  0x22   :  { %36 = dma.hbm_to_vmem [thread:$0]  %s798_s2, 2048, %s31_s30, [#allocation5], %s711_s1, %s711_s1, %s712_s13  }
  0x23   :  { %703 = dma.done.wait [#allocation3], 3072  }
  0x24   :  { %704 = vsyncadd [#allocation3], 4294964224 }
  0x25   :  { %705 = dma.done.wait [#allocation5], 2048  }
  0x26   :  { %706 = vsyncadd [#allocation5], 4294965248  ;;  %v713_v0 = vmov 0.0   ;;  %v607_v1 = vld [vmem:[#allocation2 + $0x40] sm:$0xff]   ;;  %v609_v3 = vld [vmem:[#allocation2 + $0x48] sm:$0xff]   ;;  %vm714_vm0 = vmmov 0  }
  0x27   :  { %578 = vmatprep.subr.bf16.mxu1 %v713_v0  ;;  %v608_v2 = vld [vmem:[#allocation2] sm:$0xff]   ;;  %547 = vmatprep.subr.bf16.mxu0 %v607_v1  ;;  %v610_v4 = vld [vmem:[#allocation2 + $0x8] sm:$0xff]   ;;  %v611_v5 = vld [vmem:[#allocation2 + $0x50] sm:$0xff]   ;;  %v715_v57 = vmov 0  }
  0x28   :  { %548 = vmatpush3.bf16.msra.mxu0 %v608_v2  ;;  %v612_v6 = vld [vmem:[#allocation2 + $0x10] sm:$0xff]   ;;  %v613_v7 = vld [vmem:[#allocation2 + $0x58] sm:$0xff]   ;;  %v615_v9 = vld [vmem:[#allocation2 + $0x60] sm:$0xff]   ;;  %594 = vmatprep.mubr.msk.bf16.mxu1 %vm714_vm0, %v713_v0 }
  0x29   :  { %549 = vmatprep.subr.bf16.mxu0 %v609_v3  ;;  %v614_v8 = vld [vmem:[#allocation2 + $0x18] sm:$0xff]   ;;  %v616_v10 = vld [vmem:[#allocation2 + $0x20] sm:$0xff]   ;;  %v617_v11 = vld [vmem:[#allocation2 + $0x68] sm:$0xff]  }
  0x2a   :  { %v768_v12 = vld [vmem:[%s796_s0 + $0x8] sm:$0xff]  ;;  %v623_v15 = vld [vmem:[#allocation2 + $0x80] sm:$0xff]   ;;  %v619_v16 = vld [vmem:[#allocation2 + $0x70] sm:$0xff]  }
  0x2b   :  { %v618_v13 = vld [vmem:[#allocation2 + $0x28] sm:$0xff]   ;;  %v49_v14 = vpack.c.bf16 %v768_v12, %v768_v12  ;;  %579 = vmatpush3.bf16.msra.mxu1 %v623_v15  ;;  %v620_v18 = vld [vmem:[#allocation2 + $0x30] sm:$0xff]   ;;  %v621_v19 = vld [vmem:[#allocation2 + $0x78] sm:$0xff]  }
  0x2c   :  { %550 = vmatpush3.bf16.msra.mxu0 %v610_v4  ;;  %v624_v17 = vld [vmem:[#allocation2 + $0x88] sm:$0xff]   ;;  %580 = vmatprep.subr.bf16.mxu1 %v713_v0  ;;  %v622_v20 = vld [vmem:[#allocation2 + $0x38] sm:$0xff]   ;;  %v775_v21 = vld [vmem:[%s796_s0] sm:$0xff] }
  0x2d   :  { %551 = vmatprep.subr.bf16.mxu0 %v611_v5  ;;  %217 = vmatprep.mubr.bf16.mxu0 %v49_v14  ;;  %v48_v22 = vpack.c.bf16 %v775_v21, %v775_v21  ;;  %v625_v23 = vld [vmem:[#allocation2 + $0x90] sm:$0xff]   ;;  %v626_v24 = vld [vmem:[#allocation2 + $0x98] sm:$0xff]   ;;  %v627_v25 = vld [vmem:[#allocation2 + $0xa0] sm:$0xff]   ;;  %v364_v5 = vlaneseq }
  0x2e   :  { %v628_v26 = vld [vmem:[#allocation2 + $0xa8] sm:$0xff]   ;;  %v629_v27 = vld [vmem:[#allocation2 + $0xb0] sm:$0xff]   ;;  %v630_v28 = vld [vmem:[#allocation2 + $0xb8] sm:$0xff]  }
  0x2f   :  { %581 = vmatpush3.bf16.msra.mxu1 %v624_v17  ;;  %v631_v29 = vld [vmem:[#allocation4] ss:$8 sps:$4 sm:$0xff]   ;;  %v633_v30 = vld [vmem:[#allocation4 + $0x4] ss:$8 sps:$4 sm:$0xff]   ;;  %v636_v31 = vld [vmem:[#allocation4 + $0x14] ss:$8 sps:$4 sm:$0xff]  }
  0x30   :  { %552 = vmatpush3.bf16.msra.mxu0 %v612_v6  ;;  %582 = vmatprep.subr.bf16.mxu1 %v713_v0  ;;  %v634_v32 = vld [vmem:[#allocation4 + $0x10] ss:$8 sps:$4 sm:$0xff]   ;;  %v639_v33 = vld [vmem:[#allocation4 + $0x24] ss:$8 sps:$4 sm:$0xff]   ;;  %v637_v34 = vld [vmem:[#allocation4 + $0x20] ss:$8 sps:$4 sm:$0xff]  }
  0x31   :  { %553 = vmatprep.subr.bf16.mxu0 %v613_v7  ;;  %v505_v36 = vld [vmem:[%s799_s3] ss:$0 sm:$0xff]  ;;  %v642_v47 = vld [vmem:[#allocation4 + $0x34] ss:$8 sps:$4 sm:$0xff]   ;;  %v640_v48 = vld [vmem:[#allocation4 + $0x30] ss:$8 sps:$4 sm:$0xff]  }
  0x32   :  { %v645_v49 = vld [vmem:[#allocation4 + $0x44] ss:$8 sps:$4 sm:$0xff]   ;;  %v643_v50 = vld [vmem:[#allocation4 + $0x40] ss:$8 sps:$4 sm:$0xff]   ;;  %v648_v51 = vld [vmem:[#allocation4 + $0x54] ss:$8 sps:$4 sm:$0xff]  }
  0x33   :  { %583 = vmatpush3.bf16.msra.mxu1 %v625_v23  ;;  %v646_v52 = vld [vmem:[#allocation4 + $0x50] ss:$8 sps:$4 sm:$0xff]   ;;  %v651_v53 = vld [vmem:[#allocation4 + $0x64] ss:$8 sps:$4 sm:$0xff]   ;;  %v649_v54 = vld [vmem:[#allocation4 + $0x60] ss:$8 sps:$4 sm:$0xff]  }
  0x34   :  { %554 = vmatpush3.bf16.msra.mxu0 %v614_v8  ;;  %584 = vmatprep.subr.bf16.mxu1 %v713_v0  ;;  %v654_v55 = vld [vmem:[#allocation4 + $0x74] ss:$8 sps:$4 sm:$0xff]   ;;  %v652_v56 = vld [vmem:[#allocation4 + $0x70] ss:$8 sps:$4 sm:$0xff]   ;;  %v522_v58 = vld [vmem:[%s799_s3 + $0x1] ss:$0 sm:$0xff] }
  0x35   :  { %555 = vmatprep.subr.bf16.mxu0 %v615_v9  ;;  %v365_v6 = vshrl.u32 %v364_v5, 7  ;;  %v362_v8 = vld [vmem:[%s799_s3 + $0x2] sm:$0x3] }
  0x37   :  { %585 = vmatpush3.bf16.msra.mxu1 %v626_v24  ;;  %v366_v7 = vsub.s32 0, %v365_v6  ;;  %v370_v9 = vsub.s32 1, %v365_v6 }
  0x38   :  { %556 = vmatpush3.bf16.msra.mxu0 %v616_v10  ;;  %586 = vmatprep.subr.bf16.mxu1 %v713_v0 }
  0x39   :  { %557 = vmatprep.subr.bf16.mxu0 %v617_v11  ;;  %v367_v10 = vrot.slane %v362_v8, %v366_v7  ;;  %v371_v11 = vrot.slane %v362_v8, %v370_v9 }
  0x3b   :  { %587 = vmatpush3.bf16.msra.mxu1 %v627_v25 }
  0x3c   :  { %558 = vmatpush3.bf16.msra.mxu0 %v618_v13  ;;  %588 = vmatprep.subr.bf16.mxu1 %v713_v0 }
  0x3d   :  { %559 = vmatprep.subr.bf16.mxu0 %v619_v16 }
  0x3f   :  { %589 = vmatpush3.bf16.msra.mxu1 %v628_v26 }
  0x40   :  { %560 = vmatpush3.bf16.msra.mxu0 %v620_v18  ;;  %590 = vmatprep.subr.bf16.mxu1 %v713_v0 }
  0x41   :  { %561 = vmatprep.subr.bf16.mxu0 %v621_v19 }
  0x43   :  { %591 = vmatpush3.bf16.msra.mxu1 %v629_v27 }
  0x44   :  { %562 = vmatpush3.bf16.msra.mxu0 %v622_v20  ;;  %592 = vmatprep.subr.bf16.mxu1 %v713_v0 }
  0x45   :  { %454 = vmatprep.subr.bf16.mxu0 %v633_v30 }
  0x47   :  { %218 = vmatmul.mubr.bf16.vlgmr.msra.gmra.mrb[0].mxu0 %v48_v22  ;;  %593 = vmatpush3.bf16.msra.mxu1 %v630_v28 }
  0x48   :  { %455 = vmatpush1.bf16.msra.mxu0 %v631_v29  ;;  %486 = vmatprep.mubr.bf16.mxu0 %v715_v57 }
  0x49   :  { %456 = vmatprep.subr.bf16.mxu0 %v636_v31 }
  0x4c   :  { %457 = vmatpush1.bf16.msra.mxu0 %v634_v32 }
  0x4d   :  { %458 = vmatprep.subr.bf16.mxu0 %v639_v33 }
  0x50   :  { %459 = vmatpush1.bf16.msra.mxu0 %v637_v34 }
  0x51   :  { %460 = vmatprep.subr.bf16.mxu0 %v642_v47 }
  0x54   :  { %461 = vmatpush1.bf16.msra.mxu0 %v640_v48 }
  0x55   :  { %462 = vmatprep.subr.bf16.mxu0 %v645_v49 }
  0x58   :  { %463 = vmatpush1.bf16.msra.mxu0 %v643_v50 }
  0x59   :  { %464 = vmatprep.subr.bf16.mxu0 %v648_v51 }
  0x5c   :  { %465 = vmatpush1.bf16.msra.mxu0 %v646_v52 }
  0x5d   :  { %466 = vmatprep.subr.bf16.mxu0 %v651_v53 }
  0x60   :  { %467 = vmatpush1.bf16.msra.mxu0 %v649_v54 }
  0x61   :  { %468 = vmatprep.subr.bf16.mxu0 %v654_v55 }
  0x64   :  { %469 = vmatpush1.bf16.msra.mxu0 %v652_v56 }
 0x11a   :  { %v563_v35 = vpop.f32.mrb[0].mxu0 }
 0x11b   :  { %v564_v37 = vpop.f32.mrb[1].mxu0 }
 0x11c   :  { %v565_v38 = vadd.f32 %v564_v37, %v563_v35  ;;  %v566_v39 = vpop.f32.mrb[2].mxu0 }
 0x11d   :  { %v567_v40 = vpop.f32.mrb[3].mxu0 }
 0x11e   :  { %v220_v41 = vadd.f32 %v565_v38, %v505_v36 }
 0x120   :  { %v225_v42 = vmul.f32 0.5, %v220_v41 }
 0x122   :  { %655 = vtanh.f32 %v225_v42 }
 0x12c   :  { %v656_v43 = vpop.eup %655 }
 0x12d   :  { %v227_v44 = vadd.f32 1.0, %v656_v43 }
 0x12f   :  { %v228_v45 = vmul.f32 %v227_v44, %v225_v42 }
 0x131   :  { %v229_v46 = vpack.c.bf16 %v228_v45, %v228_v45 }
 0x133   :  { %595 = vmatmul.mubr.bf16.vlgmr.msra.gmra.mrb[0].mxu1 %v229_v46 }
 0x206   :  { %v335_v59 = vpop.f32.mrb[0].mxu1 }
 0x207   :  { %v336_v60 = vadd.f32 %v522_v58, %v335_v59  ;;  %v596_v61 = vpop.f32.mrb[1].mxu1 }
 0x208   :  { %v338_v62 = vpop.f32.mrb[2].mxu1 }
 0x209   :  { %v341_v63 = vmul.f32 0.5, %v336_v60  ;;  %v597_v0 = vpop.f32.mrb[3].mxu1 }
 0x20b   :  { %657 = vtanh.f32 %v341_v63 }
 0x215   :  { %v658_v1 = vpop.eup %657 }
 0x216   :  { %v343_v2 = vadd.f32 1.0, %v658_v1 }
 0x218   :  { %v344_v3 = vmul.f32 %v343_v2, %v341_v63 }
 0x21a   :  { %v345_v4 = vpack.c.bf16 %v344_v3, %v344_v3 }
 0x21c   :  { %487 = vmatmul.mubr.bf16.vlgmr.msra.gmra.mrb[4].mxu0 %v345_v4 }
 0x2ef   :  { %v488_v13 = vpop.f32.mrb[4].mxu0 }
 0x2f0   :  { %v489_v14 = vadd.f32 %v488_v13, %v367_v10  ;;  %v490_v15 = vpop.f32.mrb[5].mxu0 }
 0x2f1   :  { %v491_v16 = vadd.f32 %v490_v15, %v371_v11  ;;  %v492_v17 = vpop.f32.mrb[6].mxu0 }
 0x2f2   :  { %v495_v18 = vadd.f32 %v489_v14, %v775_v21  ;;  %v493_v19 = vpop.f32.mrb[7].mxu0 }
 0x2f3   :  { %v496_v20 = vadd.f32 %v491_v16, %v768_v12 }
 0x2f4   :  { %497 = vst [vmem:[%s800_s4] sm:$0xff] %v495_v18 }
 0x2f5   :  { %498 = vst [vmem:[%s800_s4 + $0x8] sm:$0xff] %v496_v20 }
 0x2f6   :  { %503 = vsyncpa [#allocation3], 1 }
 0x2f7   :  { %504 = vsyncpa [#allocation5], 1 }

</bundles_post_ra>
